<compile_context>
chip_gen: v7x
topology: tpu7x:2x2x1
jax: 0.10.0
libtpu: 0.0.40
codegen_flags: <defaults>
</compile_context>

<pallas_src>
import jax
import jax.numpy as jnp
from jax.experimental import pallas as pl
from jax.experimental.pallas import tpu as pltpu

LANE = 128


def ensemble_kernel(x_ref, w_ref, b_ref, scores_ref, offsets_ref):
    """One grid step = one (batch, spatial-row-tile).

    x_ref:       (1, C, R, 128)  input tile (spatial on the minor two dims)
    w_ref:       (4, C) SMEM     ensemble-mean fused head weight
                                 (row 0 = scores, rows 1..3 = offsets)
    b_ref:       (4,)   SMEM     ensemble-mean fused head bias
    scores_ref:  (1, 1, R, 128)  scores output tile
    offsets_ref: (1, 3, R, 128)  offsets output tile
    """
    C = x_ref.shape[1]
    n_off = offsets_ref.shape[1]

    # Load each input channel plane once; reuse it for all 4 output heads.
    xs = [x_ref[0, c] for c in range(C)]          # each (R, 128) f32

    def head(o):
        acc = xs[0] * w_ref[o, 0]
        for c in range(1, C):
            acc = acc + xs[c] * w_ref[o, c]
        return acc + b_ref[o]

    scores_ref[0, 0] = head(0).astype(scores_ref.dtype)
    for j in range(n_off):
        offsets_ref[0, j] = head(1 + j).astype(offsets_ref.dtype)


def ensemble_forward(volume, scores_w, scores_b, offsets_w, offsets_b,
                     *, tile_n=131072):
    """volume: [B, C, D, H, W] f32 (NCDHW, as in PyTorch).

    scores_w:  [M, 1, C]   scores_b:  [M, 1]
    offsets_w: [M, 3, C]   offsets_b: [M, 3]
    Returns (scores [B,1,D,H,W], offsets [B,3,D,H,W]) = mean over the M models.
    """
    B, C, D, H, W = volume.shape
    N = D * H * W

    # Fold the ensemble mean into the tiny head parameters (exact: the
    # synthetic sub-models are pure linear heads) and fuse scores+offsets
    # into a single 4-row head; row 0 = scores, rows 1..3 = offsets.
    w_fused = jnp.concatenate([scores_w, offsets_w], axis=1).astype(jnp.float32)  # (M, 4, C)
    b_fused = jnp.concatenate([scores_b, offsets_b], axis=1).astype(jnp.float32)  # (M, 4)
    w_mean = jnp.mean(w_fused, axis=0)      # (4, C)
    b_mean = jnp.mean(b_fused, axis=0)      # (4,)
    n_heads = w_mean.shape[0]
    n_off = n_heads - 1

    # Spatial-minor dense layout: flatten N -> (rows, 128) so the last two
    # dims are (sublane, lane) dense regardless of the small channel counts.
    rows_total = pl.cdiv(N, LANE)
    # Rows per grid step (multiple of 8 sublanes), derived from tile_n elems.
    rows_per_tile = max(8, (tile_n // LANE) // 8 * 8)
    if rows_per_tile >= rows_total:
        rows_per_tile = rows_total          # single tile: full-extent block
        rows_padded = rows_total
    else:
        rows_padded = pl.cdiv(rows_total, rows_per_tile) * rows_per_tile
    n_padded = rows_padded * LANE
    num_row_tiles = rows_padded // rows_per_tile

    x = volume.astype(jnp.float32).reshape(B, C, N)
    if n_padded != N:
        x = jnp.pad(x, ((0, 0), (0, 0), (0, n_padded - N)))
    x4 = x.reshape(B, C, rows_padded, LANE)   # metadata-only reshape (row-major)

    cost = pl.CostEstimate(
        flops=2 * B * n_heads * C * n_padded,
        transcendentals=0,
        bytes_accessed=4 * (B * C * n_padded + B * n_heads * n_padded
                            + n_heads * C + n_heads),
    )

    scores4, offsets4 = pl.pallas_call(
        ensemble_kernel,
        out_shape=(
            jax.ShapeDtypeStruct((B, 1, rows_padded, LANE), jnp.float32),
            jax.ShapeDtypeStruct((B, n_off, rows_padded, LANE), jnp.float32),
        ),
        grid_spec=pltpu.PrefetchScalarGridSpec(
            num_scalar_prefetch=0,
            grid=(B, num_row_tiles),
            in_specs=[
                pl.BlockSpec((1, C, rows_per_tile, LANE),
                             lambda b, r: (b, 0, r, 0)),              # x tile
                pl.BlockSpec(memory_space=pltpu.MemorySpace.SMEM),    # w_mean (4,C)
                pl.BlockSpec(memory_space=pltpu.MemorySpace.SMEM),    # b_mean (4,)
            ],
            out_specs=[
                pl.BlockSpec((1, 1, rows_per_tile, LANE),
                             lambda b, r: (b, 0, r, 0)),              # scores tile
                pl.BlockSpec((1, n_off, rows_per_tile, LANE),
                             lambda b, r: (b, 0, r, 0)),              # offsets tile
            ],
        ),
        compiler_params=pltpu.CompilerParams(
            dimension_semantics=("parallel", "parallel"),
            vmem_limit_bytes=48 * 1024 * 1024,
        ),
        cost_estimate=cost,
    )(x4, w_mean, b_mean)

    scores = scores4.reshape(B, 1, n_padded)
    offsets = offsets4.reshape(B, n_off, n_padded)
    if n_padded != N:
        scores = scores[:, :, :N]
        offsets = offsets[:, :, :N]
    scores = scores.reshape(B, 1, D, H, W)
    offsets = offsets.reshape(B, n_off, D, H, W)
    return scores, offsets


def ensemble_reference(volume, scores_w, scores_b, offsets_w, offsets_b):
    """Pure-JAX reference mirroring torch.stack(per-model outputs).mean(0)."""
    B, C, D, H, W = volume.shape
    x = volume.reshape(B, C, -1)
    all_s = jnp.einsum('moc,bcn->mbon', scores_w, x) + scores_b[:, None, :, None]
    all_o = jnp.einsum('moc,bcn->mbon', offsets_w, x) + offsets_b[:, None, :, None]
    s = jnp.mean(all_s, axis=0).reshape(B, 1, D, H, W)
    o = jnp.mean(all_o, axis=0).reshape(B, 3, D, H, W)
    return s, o


if __name__ == "__main__":
    key = jax.random.PRNGKey(0)
    k_vol, k_sw, k_sb, k_ow, k_ob = jax.random.split(key, 5)

    B, C, D, H, W = 2, 4, 8, 8, 8   # small NCDHW volume, N = 512 (lane-aligned)
    M = 3                           # number of models in the ensemble

    volume = jax.random.normal(k_vol, (B, C, D, H, W), dtype=jnp.float32)
    # Deterministic synthetic per-model head parameters (linear 1x1x1 heads).
    scores_w = jax.random.normal(k_sw, (M, 1, C), dtype=jnp.float32) * 0.1
    scores_b = jax.random.normal(k_sb, (M, 1), dtype=jnp.float32) * 0.1
    offsets_w = jax.random.normal(k_ow, (M, 3, C), dtype=jnp.float32) * 0.1
    offsets_b = jax.random.normal(k_ob, (M, 3), dtype=jnp.float32) * 0.1

    scores, offsets = jax.jit(ensemble_forward)(
        volume, scores_w, scores_b, offsets_w, offsets_b)
    jax.block_until_ready((scores, offsets))

    s_ref, o_ref = ensemble_reference(volume, scores_w, scores_b,
                                      offsets_w, offsets_b)
    assert scores.shape == (B, 1, D, H, W) and offsets.shape == (B, 3, D, H, W)
    assert jnp.allclose(scores, s_ref, atol=1e-4, rtol=1e-4)
    assert jnp.allclose(offsets, o_ref, atol=1e-4, rtol=1e-4)

    print("KERNEL_OK")
</pallas_src>

<mosaic_0001>
module attributes {stable_mosaic.version = 11 : i64} {
  func.func @ensemble_kernel(%arg0: i32, %arg1: i32, %arg2: memref<1x4x4x128xf32, #tpu.memory_space<vmem>>, %arg3: memref<4x4xf32, #tpu.memory_space<smem>>, %arg4: memref<4xf32, #tpu.memory_space<smem>>, %arg5: memref<1x1x4x128xf32, #tpu.memory_space<vmem>>, %arg6: memref<1x3x4x128xf32, #tpu.memory_space<vmem>>) attributes {dimension_semantics = [#tpu.dimension_semantics<parallel>, #tpu.dimension_semantics<parallel>], iteration_bounds = array<i64: 2, 1>, scalar_prefetch = 0 : i64, scratch_operands = 0 : i64, tpu.core_type = #tpu.core_type<tc>, window_params = [{transform_indices = @transform_0, window_bounds = array<i64: 1, 4, 4, 128>}, {transform_indices = @transform_1, window_bounds = array<i64: 4, 4>}, {transform_indices = @transform_2, window_bounds = array<i64: 4>}, {transform_indices = @transform_3, window_bounds = array<i64: 1, 1, 4, 128>}, {transform_indices = @transform_4, window_bounds = array<i64: 1, 3, 4, 128>}]} {
    %c0 = arith.constant 0 : index
    %c0_0 = arith.constant 0 : index
    %c0_1 = arith.constant 0 : index
    %c0_2 = arith.constant 0 : index
    %0 = vector.load %arg2[%c0, %c0_0, %c0_1, %c0_2] : memref<1x4x4x128xf32, #tpu.memory_space<vmem>>, vector<1x1x4x128xf32>
    %1 = vector.shape_cast %0 : vector<1x1x4x128xf32> to vector<4x128xf32>
    %c0_3 = arith.constant 0 : index
    %c1 = arith.constant 1 : index
    %c0_4 = arith.constant 0 : index
    %c0_5 = arith.constant 0 : index
    %2 = vector.load %arg2[%c0_3, %c1, %c0_4, %c0_5] : memref<1x4x4x128xf32, #tpu.memory_space<vmem>>, vector<1x1x4x128xf32>
    %3 = vector.shape_cast %2 : vector<1x1x4x128xf32> to vector<4x128xf32>
    %c0_6 = arith.constant 0 : index
    %c2 = arith.constant 2 : index
    %c0_7 = arith.constant 0 : index
    %c0_8 = arith.constant 0 : index
    %4 = vector.load %arg2[%c0_6, %c2, %c0_7, %c0_8] : memref<1x4x4x128xf32, #tpu.memory_space<vmem>>, vector<1x1x4x128xf32>
    %5 = vector.shape_cast %4 : vector<1x1x4x128xf32> to vector<4x128xf32>
    %c0_9 = arith.constant 0 : index
    %c3 = arith.constant 3 : index
    %c0_10 = arith.constant 0 : index
    %c0_11 = arith.constant 0 : index
    %6 = vector.load %arg2[%c0_9, %c3, %c0_10, %c0_11] : memref<1x4x4x128xf32, #tpu.memory_space<vmem>>, vector<1x1x4x128xf32>
    %7 = vector.shape_cast %6 : vector<1x1x4x128xf32> to vector<4x128xf32>
    %c0_12 = arith.constant 0 : index
    %c0_13 = arith.constant 0 : index
    %8 = memref.load %arg3[%c0_12, %c0_13] : memref<4x4xf32, #tpu.memory_space<smem>>
    %9 = vector.broadcast %8 : f32 to vector<4x128xf32>
    %10 = arith.mulf %1, %9 : vector<4x128xf32>
    %c0_14 = arith.constant 0 : index
    %c1_15 = arith.constant 1 : index
    %11 = memref.load %arg3[%c0_14, %c1_15] : memref<4x4xf32, #tpu.memory_space<smem>>
    %12 = vector.broadcast %11 : f32 to vector<4x128xf32>
    %13 = arith.mulf %3, %12 : vector<4x128xf32>
    %14 = arith.addf %10, %13 : vector<4x128xf32>
    %c0_16 = arith.constant 0 : index
    %c2_17 = arith.constant 2 : index
    %15 = memref.load %arg3[%c0_16, %c2_17] : memref<4x4xf32, #tpu.memory_space<smem>>
    %16 = vector.broadcast %15 : f32 to vector<4x128xf32>
    %17 = arith.mulf %5, %16 : vector<4x128xf32>
    %18 = arith.addf %14, %17 : vector<4x128xf32>
    %c0_18 = arith.constant 0 : index
    %c3_19 = arith.constant 3 : index
    %19 = memref.load %arg3[%c0_18, %c3_19] : memref<4x4xf32, #tpu.memory_space<smem>>
    %20 = vector.broadcast %19 : f32 to vector<4x128xf32>
    %21 = arith.mulf %7, %20 : vector<4x128xf32>
    %22 = arith.addf %18, %21 : vector<4x128xf32>
    %c0_20 = arith.constant 0 : index
    %23 = memref.load %arg4[%c0_20] : memref<4xf32, #tpu.memory_space<smem>>
    %24 = vector.broadcast %23 : f32 to vector<4x128xf32>
    %25 = arith.addf %22, %24 : vector<4x128xf32>
    %c0_21 = arith.constant 0 : index
    %c0_22 = arith.constant 0 : index
    %c0_23 = arith.constant 0 : index
    %c0_24 = arith.constant 0 : index
    %26 = vector.load %arg5[%c0_21, %c0_22, %c0_23, %c0_24] : memref<1x1x4x128xf32, #tpu.memory_space<vmem>>, vector<1x1x4x128xf32>
    %27 = vector.shape_cast %26 : vector<1x1x4x128xf32> to vector<4x128xf32>
    %28 = vector.shape_cast %25 : vector<4x128xf32> to vector<1x1x4x128xf32>
    tpu.vector_store %arg5[%c0_21, %c0_22, %c0_23, %c0_24], %28 {strides = array<i32>} : memref<1x1x4x128xf32, #tpu.memory_space<vmem>>, vector<1x1x4x128xf32>,
    %c1_25 = arith.constant 1 : index
    %c0_26 = arith.constant 0 : index
    %29 = memref.load %arg3[%c1_25, %c0_26] : memref<4x4xf32, #tpu.memory_space<smem>>
    %30 = vector.broadcast %29 : f32 to vector<4x128xf32>
    %31 = arith.mulf %1, %30 : vector<4x128xf32>
    %c1_27 = arith.constant 1 : index
    %c1_28 = arith.constant 1 : index
    %32 = memref.load %arg3[%c1_27, %c1_28] : memref<4x4xf32, #tpu.memory_space<smem>>
    %33 = vector.broadcast %32 : f32 to vector<4x128xf32>
    %34 = arith.mulf %3, %33 : vector<4x128xf32>
    %35 = arith.addf %31, %34 : vector<4x128xf32>
    %c1_29 = arith.constant 1 : index
    %c2_30 = arith.constant 2 : index
    %36 = memref.load %arg3[%c1_29, %c2_30] : memref<4x4xf32, #tpu.memory_space<smem>>
    %37 = vector.broadcast %36 : f32 to vector<4x128xf32>
    %38 = arith.mulf %5, %37 : vector<4x128xf32>
    %39 = arith.addf %35, %38 : vector<4x128xf32>
    %c1_31 = arith.constant 1 : index
    %c3_32 = arith.constant 3 : index
    %40 = memref.load %arg3[%c1_31, %c3_32] : memref<4x4xf32, #tpu.memory_space<smem>>
    %41 = vector.broadcast %40 : f32 to vector<4x128xf32>
    %42 = arith.mulf %7, %41 : vector<4x128xf32>
    %43 = arith.addf %39, %42 : vector<4x128xf32>
    %c1_33 = arith.constant 1 : index
    %44 = memref.load %arg4[%c1_33] : memref<4xf32, #tpu.memory_space<smem>>
    %45 = vector.broadcast %44 : f32 to vector<4x128xf32>
    %46 = arith.addf %43, %45 : vector<4x128xf32>
    %c0_34 = arith.constant 0 : index
    %c0_35 = arith.constant 0 : index
    %c0_36 = arith.constant 0 : index
    %c0_37 = arith.constant 0 : index
    %47 = vector.load %arg6[%c0_34, %c0_35, %c0_36, %c0_37] : memref<1x3x4x128xf32, #tpu.memory_space<vmem>>, vector<1x1x4x128xf32>
    %48 = vector.shape_cast %47 : vector<1x1x4x128xf32> to vector<4x128xf32>
    %49 = vector.shape_cast %46 : vector<4x128xf32> to vector<1x1x4x128xf32>
    tpu.vector_store %arg6[%c0_34, %c0_35, %c0_36, %c0_37], %49 {strides = array<i32>} : memref<1x3x4x128xf32, #tpu.memory_space<vmem>>, vector<1x1x4x128xf32>,
    %c2_38 = arith.constant 2 : index
    %c0_39 = arith.constant 0 : index
    %50 = memref.load %arg3[%c2_38, %c0_39] : memref<4x4xf32, #tpu.memory_space<smem>>
    %51 = vector.broadcast %50 : f32 to vector<4x128xf32>
    %52 = arith.mulf %1, %51 : vector<4x128xf32>
    %c2_40 = arith.constant 2 : index
    %c1_41 = arith.constant 1 : index
    %53 = memref.load %arg3[%c2_40, %c1_41] : memref<4x4xf32, #tpu.memory_space<smem>>
    %54 = vector.broadcast %53 : f32 to vector<4x128xf32>
    %55 = arith.mulf %3, %54 : vector<4x128xf32>
    %56 = arith.addf %52, %55 : vector<4x128xf32>
    %c2_42 = arith.constant 2 : index
    %c2_43 = arith.constant 2 : index
    %57 = memref.load %arg3[%c2_42, %c2_43] : memref<4x4xf32, #tpu.memory_space<smem>>
    %58 = vector.broadcast %57 : f32 to vector<4x128xf32>
    %59 = arith.mulf %5, %58 : vector<4x128xf32>
    %60 = arith.addf %56, %59 : vector<4x128xf32>
    %c2_44 = arith.constant 2 : index
    %c3_45 = arith.constant 3 : index
    %61 = memref.load %arg3[%c2_44, %c3_45] : memref<4x4xf32, #tpu.memory_space<smem>>
    %62 = vector.broadcast %61 : f32 to vector<4x128xf32>
    %63 = arith.mulf %7, %62 : vector<4x128xf32>
    %64 = arith.addf %60, %63 : vector<4x128xf32>
    %c2_46 = arith.constant 2 : index
    %65 = memref.load %arg4[%c2_46] : memref<4xf32, #tpu.memory_space<smem>>
    %66 = vector.broadcast %65 : f32 to vector<4x128xf32>
    %67 = arith.addf %64, %66 : vector<4x128xf32>
    %c0_47 = arith.constant 0 : index
    %c1_48 = arith.constant 1 : index
    %c0_49 = arith.constant 0 : index
    %c0_50 = arith.constant 0 : index
    %68 = vector.load %arg6[%c0_47, %c1_48, %c0_49, %c0_50] : memref<1x3x4x128xf32, #tpu.memory_space<vmem>>, vector<1x1x4x128xf32>
    %69 = vector.shape_cast %68 : vector<1x1x4x128xf32> to vector<4x128xf32>
    %70 = vector.shape_cast %67 : vector<4x128xf32> to vector<1x1x4x128xf32>
    tpu.vector_store %arg6[%c0_47, %c1_48, %c0_49, %c0_50], %70 {strides = array<i32>} : memref<1x3x4x128xf32, #tpu.memory_space<vmem>>, vector<1x1x4x128xf32>,
    %c3_51 = arith.constant 3 : index
    %c0_52 = arith.constant 0 : index
    %71 = memref.load %arg3[%c3_51, %c0_52] : memref<4x4xf32, #tpu.memory_space<smem>>
    %72 = vector.broadcast %71 : f32 to vector<4x128xf32>
    %73 = arith.mulf %1, %72 : vector<4x128xf32>
    %c3_53 = arith.constant 3 : index
    %c1_54 = arith.constant 1 : index
    %74 = memref.load %arg3[%c3_53, %c1_54] : memref<4x4xf32, #tpu.memory_space<smem>>
    %75 = vector.broadcast %74 : f32 to vector<4x128xf32>
    %76 = arith.mulf %3, %75 : vector<4x128xf32>
    %77 = arith.addf %73, %76 : vector<4x128xf32>
    %c3_55 = arith.constant 3 : index
    %c2_56 = arith.constant 2 : index
    %78 = memref.load %arg3[%c3_55, %c2_56] : memref<4x4xf32, #tpu.memory_space<smem>>
    %79 = vector.broadcast %78 : f32 to vector<4x128xf32>
    %80 = arith.mulf %5, %79 : vector<4x128xf32>
    %81 = arith.addf %77, %80 : vector<4x128xf32>
    %c3_57 = arith.constant 3 : index
    %c3_58 = arith.constant 3 : index
    %82 = memref.load %arg3[%c3_57, %c3_58] : memref<4x4xf32, #tpu.memory_space<smem>>
    %83 = vector.broadcast %82 : f32 to vector<4x128xf32>
    %84 = arith.mulf %7, %83 : vector<4x128xf32>
    %85 = arith.addf %81, %84 : vector<4x128xf32>
    %c3_59 = arith.constant 3 : index
    %86 = memref.load %arg4[%c3_59] : memref<4xf32, #tpu.memory_space<smem>>
    %87 = vector.broadcast %86 : f32 to vector<4x128xf32>
    %88 = arith.addf %85, %87 : vector<4x128xf32>
    %c0_60 = arith.constant 0 : index
    %c2_61 = arith.constant 2 : index
    %c0_62 = arith.constant 0 : index
    %c0_63 = arith.constant 0 : index
    %89 = vector.load %arg6[%c0_60, %c2_61, %c0_62, %c0_63] : memref<1x3x4x128xf32, #tpu.memory_space<vmem>>, vector<1x1x4x128xf32>
    %90 = vector.shape_cast %89 : vector<1x1x4x128xf32> to vector<4x128xf32>
    %91 = vector.shape_cast %88 : vector<4x128xf32> to vector<1x1x4x128xf32>
    tpu.vector_store %arg6[%c0_60, %c2_61, %c0_62, %c0_63], %91 {strides = array<i32>} : memref<1x3x4x128xf32, #tpu.memory_space<vmem>>, vector<1x1x4x128xf32>,
    return
  }
  func.func @transform_0(%arg0: i32, %arg1: i32) -> (i32, i32, i32, i32) {
    %c0_i32 = arith.constant 0 : i32
    %c0_i32_0 = arith.constant 0 : i32
    %c0_i32_1 = arith.constant 0 : i32
    return %arg0, %c0_i32, %arg1, %c0_i32_0 : i32, i32, i32, i32
  }
  func.func @transform_1(%arg0: i32, %arg1: i32) -> (i32, i32) {
    %c0_i32 = arith.constant 0 : i32
    %c0_i32_0 = arith.constant 0 : i32
    %c0_i32_1 = arith.constant 0 : i32
    return %c0_i32, %c0_i32_0 : i32, i32
  }
  func.func @transform_2(%arg0: i32, %arg1: i32) -> i32 {
    %c0_i32 = arith.constant 0 : i32
    %c0_i32_0 = arith.constant 0 : i32
    return %c0_i32 : i32
  }
  func.func @transform_3(%arg0: i32, %arg1: i32) -> (i32, i32, i32, i32) {
    %c0_i32 = arith.constant 0 : i32
    %c0_i32_0 = arith.constant 0 : i32
    %c0_i32_1 = arith.constant 0 : i32
    return %arg0, %c0_i32, %arg1, %c0_i32_0 : i32, i32, i32, i32
  }
  func.func @transform_4(%arg0: i32, %arg1: i32) -> (i32, i32, i32, i32) {
    %c0_i32 = arith.constant 0 : i32
    %c0_i32_0 = arith.constant 0 : i32
    %c0_i32_1 = arith.constant 0 : i32
    return %arg0, %c0_i32, %arg1, %c0_i32_0 : i32, i32, i32, i32
  }
}

</mosaic_0001>

<bundles_post_ra>
// kernel: ensemble_forward.1
= control target key start
LH: loop header
LB: loop body
LE: loop exit
PB: predicated region body
PF: predicated region fallthrough
CT: control target
= control target key end

     0   :  { %10 = vsyncpa [#allocation3], 0  ;;  %s801_s0 = inlined_call_operand.vmem [shape: f32[2,4,4,128], index: 0, kind: input, shape index: {}]   ;;  %s802_s1 = inlined_call_operand.vmem [shape: f32[4,4], index: 1, kind: input, shape index: {}]   ;;  %s803_s2 = inlined_call_operand.vmem [shape: f32[4], index: 2, kind: input, shape index: {}]   ;;  %s804_s3 = inlined_call_operand.vmem [shape: f32[2,1,4,128], index: 3, kind: output, shape index: {0}]   ;;  %s805_s4 = inlined_call_operand.vmem [shape: f32[2,3,4,128], index: 4, kind: output, shape index: {1}]  }
   0x1   :  { %11 = vsyncpa [#allocation5], 0  ;;  %s681_s15 = smov 0   ;;  %s683_s16 = smov 0  }
   0x2   :  { %s685_s17 = smov 0  }
   0x3 LB: > { %s507_s18 = sadd.s32 4294967295, %s652_s17   ;;  %s29_s19 = sadd.s32 1, %s648_s16  ;;  %s652_s17 = sphi %s685_s17, %s17_s17   ;;  %s648_s16 = sphi %s683_s16, %s815_s16   ;;  %s644_s15 = sphi %s681_s15, %s814_s15  }
   0x4   : > { %p31_p0 = scmp.ge.s32.totalorder %s29_s19, 2  ;;  %p509_p1 = scmp.ge.s32.totalorder %s652_s17, 1 }
   0x5   : > { %p160_p2 = scmp.lt.s32.totalorder %s652_s17, 3  ;;  %p706_p4 = scmp.eq.s32.totalorder %s507_s18, 0 }
   0x6   : > { %s817_s19 = smov (%p31_p0, %s29_s19), 0  ;;  %s173_s24 = sshll.u32 %s802_s1, 4  ;;  %s174_s24 = int_to_ptr.vmem [resolvable:$true] %s173_s24 }
   0x7   : > { %p702_p3 = pnand %p509_p1, %p160_p2  ;;  %s184_s27 = sshll.u32 %s803_s2, 4  ;;  %s185_s27 = int_to_ptr.vmem [resolvable:$true] %s184_s27 }
   0x8   : > { %s810_s21 = scalar_select %p706_p4, 1, 0 }
   0x9   : > { %s809_s20 = scalar_select %p702_p3, 1, 0 }
   0xa   : > { %p555_p5 = pneg %p702_p3  ;;  %s592_s29 = scalar_lea.vmem %s174_s24, 64 }
   0xb   : > { %p593_p7 = scmp.ne.s32.totalorder %s174_s24, %s592_s29  ;;  %p600_p11 = scmp.lt.s32.totalorder %s174_s24, %s174_s24 }
   0xc   : > { %p720_p6 = pnand %p706_p4, %p555_p5  ;;  %p601_p12 = scmp.lt.s32.totalorder %s592_s29, %s592_s29 }
   0xe   : > { %p594_p8 = pneg %p720_p6  ;;  %p602_p13 = por %p601_p12, %p600_p11 }
  0x10   : > { %p595_p9 = pnand %p594_p8, %p593_p7 }
  0x12   : > { %p596_p10 = pneg %p595_p9 }
  0x14   : > { %p603_p0 = pnand %p602_p13, %p596_p10 }
  0x16   : > { %606 = shalt.err (!%p603_p0)
}
  0x17   : > { %s654_s30 = smov [#allocation2]   ;;  %s607_s5 = scalar_lea.vmem %s185_s27, 16 }
  0x18   : > { %558 = dma.vmem_to_smem (!%p720_p6), %s174_s24, 64, %s654_s30, [#allocation3]  }
  0x19   : > { %p608_p1 = scmp.ne.s32.totalorder %s185_s27, %s607_s5  ;;  %p615_p4 = scmp.lt.s32.totalorder %s185_s27, %s185_s27 }
  0x1a   : > { %p616_p3 = scmp.lt.s32.totalorder %s607_s5, %s607_s5 }
  0x1b   : > { %p610_p2 = pnand %p608_p1, %p594_p8 }
  0x1c   : > { %p617_p7 = por %p616_p3, %p615_p4 }
  0x1d   : > { %p611_p5 = pneg %p610_p2 }
  0x1f   : > { %p618_p9 = pnand %p617_p7, %p611_p5 }
  0x21   : > { %621 = shalt.err (!%p618_p9)
}
  0x22   : > { %s655_s6 = smov [#allocation4]   ;;  %p812_p10 = scmp.ne.s32.totalorder %s809_s20, 0 }
  0x23   : > { %561 = dma.vmem_to_smem (!%p720_p6), %s185_s27, 16, %s655_s6, [#allocation5]  }
  0x24   : > { %208 = sbr.rel (%p812_p10) target bundleno = 77 (0x4d), region = 32  ;;  %p813_p11 = scmp.ne.s32.totalorder (!%p812_p10), %s810_s21, 0 }
  0x2b   : > { %635 = dma.done.wait (%p813_p11), [#allocation3], 64  }
  0x2c   : > { %637 = vsyncadd (%p813_p11), [#allocation3], 4294967232 }
  0x2d   : > { %639 = dma.done.wait (%p813_p11), [#allocation5], 16  }
  0x2e   : > { %641 = vsyncadd (%p813_p11), [#allocation5], 4294967280 }
  0x2f   : > { %218 = sfence }
  0x30   : > { %p252_p3 = scmp.lt.s32.totalorder %s644_s15, 1  ;;  %s282_s7 = sld [smem:[#allocation2]] }
  0x31   : > { %s523_s8 = sld [smem:[#allocation2 + $0x1]]  ;;  %s524_s9 = sld [smem:[#allocation2 + $0x2]] }
  0x32   : > { %s819_s15 = smov (!%p252_p3, %s644_s15), 1  ;;  %s525_s10 = sld [smem:[#allocation2 + $0x3]] }
  0x33   : > { %s545_s11 = sshll.u32 %s819_s15, 4  ;;  %s748_s18 = sld [smem:[#allocation4]] }
  0x34   : > { %s259_s14 = scalar_lea.vmem %s801_s0, %s545_s11  ;;  %s526_s20 = sld [smem:[#allocation2 + $0x80]] }
  0x35   : > { %v275_v0 = vld [vmem:[%s259_s14] sm:$0xf]  ;;  %v520_v1 = vld [vmem:[%s259_s14 + $0x4] sm:$0xf]  ;;  %v521_v2 = vld [vmem:[%s259_s14 + $0x8] sm:$0xf] }
  0x36   : > { %v283_v3 = vstv %s282_s7  ;;  %v750_v4 = vld [vmem:[%s259_s14 + $0xc] sm:$0xf]  ;;  %s527_s21 = sld [smem:[#allocation2 + $0x81]]  ;;  %s528_s22 = sld [smem:[#allocation2 + $0x82]] }
  0x37   : > { %v284_v5 = vmul.f32 %v283_v3, %v275_v0  ;;  %v286_v6 = vstv %s523_s8  ;;  %v290_v7 = vstv %s524_s9  ;;  %s529_s23 = sld [smem:[#allocation2 + $0x83]]  ;;  %s753_s24 = sld [smem:[#allocation4 + $0x1]] }
  0x38   : > { %v287_v8 = vmul.f32 %v520_v1, %v286_v6  ;;  %v291_v9 = vmul.f32 %v521_v2, %v290_v7  ;;  %v294_v10 = vstv %s525_s10  ;;  %s531_s25 = sld [smem:[#allocation2 + $0x100]]  ;;  %s755_s26 = sld [smem:[#allocation2 + $0x101]] }
  0x39   : > { %v295_v12 = vmul.f32 %v750_v4, %v294_v10  ;;  %s757_s27 = sld [smem:[#allocation2 + $0x102]]  ;;  %s518_s28 = sshll.u32 %s819_s15, 2  ;;  %v298_v14 = vstv %s748_s18 }
  0x3a   : > { %v288_v11 = vadd.f32 %v287_v8, %v284_v5  ;;  %s760_s29 = sld [smem:[#allocation2 + $0x103]]  ;;  %v302_v15 = vstv %s526_s20  ;;  %s763_s30 = sld [smem:[#allocation2 + $0x180]] }
  0x3b   : > { %s765_s5 = sld [smem:[#allocation2 + $0x181]]  ;;  %v303_v17 = vmul.f32 %v302_v15, %v275_v0  ;;  %s539_s6 = sld [smem:[#allocation2 + $0x182]] }
  0x3c   : > { %v292_v13 = vadd.f32 %v291_v9, %v288_v11  ;;  %v305_v18 = vstv %s527_s21  ;;  %v309_v19 = vstv %s528_s22  ;;  %s767_s7 = sld [smem:[#allocation2 + $0x183]]  ;;  %s266_s10 = scalar_lea.vmem %s804_s3, %s518_s28 }
  0x3d   : > { %v306_v20 = vmul.f32 %v520_v1, %v305_v18  ;;  %v310_v21 = vmul.f32 %v521_v2, %v309_v19  ;;  %v313_v22 = vstv %s529_s23  ;;  %s772_s11 = sld [smem:[#allocation4 + $0x2]]  ;;  %s777_s12 = sld [smem:[#allocation4 + $0x3]]  ;;  %v317_v30 = vstv %s753_s24 }
  0x3e   : > { %v296_v16 = vadd.f32 %v295_v12, %v292_v13  ;;  %v314_v24 = vmul.f32 %v750_v4, %v313_v22  ;;  %v321_v25 = vstv %s531_s25  ;;  %v324_v28 = vstv %s755_s26  ;;  %s546_s13 = smul.u32 12, %s819_s15 }
  0x3f   : > { %v307_v26 = vadd.f32 %v306_v20, %v303_v17  ;;  %v322_v27 = vmul.f32 %v321_v25, %v275_v0  ;;  %v328_v29 = vstv %s757_s27  ;;  %v325_v31 = vmul.f32 %v520_v1, %v324_v28 }
  0x40   : > { %v299_v23 = vadd.f32 %v298_v14, %v296_v16  ;;  %v329_v32 = vmul.f32 %v521_v2, %v328_v29  ;;  %v332_v33 = vstv %s760_s29  ;;  %v341_v36 = vstv %s763_s30  ;;  %s274_s18 = scalar_lea.vmem %s805_s4, %s546_s13 }
  0x41   : > { %v311_v34 = vadd.f32 %v310_v21, %v307_v26  ;;  %v333_v35 = vmul.f32 %v750_v4, %v332_v33  ;;  %v344_v37 = vstv %s765_s5  ;;  %v326_v38 = vadd.f32 %v325_v31, %v322_v27 }
  0x42   : > { %300 = vst [vmem:[%s266_s10] sm:$0xf] %v299_v23  ;;  %v342_v39 = vmul.f32 %v341_v36, %v275_v0  ;;  %v345_v40 = vmul.f32 %v520_v1, %v344_v37  ;;  %v348_v41 = vstv %s539_s6  ;;  %v352_v44 = vstv %s767_s7 }
  0x43   : > { %v315_v42 = vadd.f32 %v314_v24, %v311_v34  ;;  %v349_v43 = vmul.f32 %v521_v2, %v348_v41  ;;  %v330_v45 = vadd.f32 %v329_v32, %v326_v38  ;;  %v353_v47 = vmul.f32 %v750_v4, %v352_v44 }
  0x44   : > { %v346_v46 = vadd.f32 %v345_v40, %v342_v39  ;;  %v336_v49 = vstv %s772_s11  ;;  %v356_v52 = vstv %s777_s12 }
  0x45   : > { %v318_v48 = vadd.f32 %v317_v30, %v315_v42  ;;  %v334_v50 = vadd.f32 %v333_v35, %v330_v45 }
  0x46   : > { %v350_v51 = vadd.f32 %v349_v43, %v346_v46 }
  0x47   : > { %319 = vst [vmem:[%s274_s18] sm:$0xf] %v318_v48  ;;  %v337_v53 = vadd.f32 %v336_v49, %v334_v50 }
  0x48   : > { %v354_v54 = vadd.f32 %v353_v47, %v350_v51 }
  0x49   : > { %536 = vst [vmem:[%s274_s18 + $0x4] sm:$0xf] %v337_v53 }
  0x4a   : > { %v357_v55 = vadd.f32 %v356_v52, %v354_v54 }
  0x4c   : > { %542 = vst [vmem:[%s274_s18 + $0x8] sm:$0xf] %v357_v55 }
  0x4d PF: > { %s17_s17 = sadd.s32 1, %s652_s17   ;;  %s814_s15 = smov %s648_s16 }
  0x4e   : > { %p14_p4 = scmp.ge.s32.totalorder %s17_s17, 4   ;;  %s815_s16 = smov %s817_s19 }
  0x50   :  { %16 = sbr.rel (!%p14_p4) target bundleno = 3 (0x3), region = 88 }
  0x57   :  { %407 = vsyncpa [#allocation3], 1 }
  0x58   :  { %409 = vsyncpa [#allocation3 + $0x1], 1 }
  0x59   :  { %410 = vsyncpa [#allocation5], 1 }

</bundles_post_ra>
